<compile_context>
chip_gen: v5e
topology: v5e:2x2
jax: 0.10.0
libtpu: 0.0.40
codegen_flags: <defaults>
</compile_context>

<pallas_src>
import jax
import jax.numpy as jnp
from jax.experimental import pallas as pl
from jax.experimental.pallas import tpu as pltpu

LN_EPS = 1e-5   # torch.nn.LayerNorm default
MIN_TM = 8      # sublane granularity
TM_MAX = 512    # batch-tile cap.  Constraint is vreg pressure / grid granularity, not
                # VMEM: a [512,128] f32 intermediate is 64 vregs, and measured tiling
                # data shows 512-row tiles already reach ~85% of HBM roofline; bigger
                # tiles only add spill traffic and starve v7x's second core of tiles.


def _round_up(x, m):
    return ((x + m - 1) // m) * m


def _cdiv(a, b):
    return -(-a // b)


def _layernorm_f32(h, gamma, beta):
    # One-pass mean/variance (var = E[h^2] - E[h]^2): one fewer [tm,128] temp than
    # mean((h-mu)^2).  Biased variance + eps inside rsqrt == torch.nn.LayerNorm.
    mu = jnp.mean(h, axis=-1, keepdims=True)
    var = jnp.maximum(jnp.mean(h * h, axis=-1, keepdims=True) - mu * mu, 0.0)
    return (h - mu) * jax.lax.rsqrt(var + LN_EPS) * gamma + beta


def droq_critic_kernel(
    obs_ref, act_ref,
    w1o_ref, w1a_ref, b1_ref, g1_ref, be1_ref,
    w2_ref, b2_ref, g2_ref, be2_ref,
    w3_ref, b3_ref,
    out_ref,
):
    # ---- layer 1: (obs @ W1o + act @ W1a) + b1 -> LayerNorm -> ReLU ----
    obs = obs_ref[...].astype(jnp.bfloat16)
    act = act_ref[...].astype(jnp.bfloat16)
    h = (jnp.dot(obs, w1o_ref[...], preferred_element_type=jnp.float32)
         + jnp.dot(act, w1a_ref[...], preferred_element_type=jnp.float32)
         + b1_ref[...])
    h = _layernorm_f32(h, g1_ref[...], be1_ref[...])
    h = jnp.maximum(h, 0.0)

    # ---- layer 2: Linear -> LayerNorm -> ReLU ----
    h = jnp.dot(h.astype(jnp.bfloat16), w2_ref[...],
                preferred_element_type=jnp.float32) + b2_ref[...]
    h = _layernorm_f32(h, g2_ref[...], be2_ref[...])
    h = jnp.maximum(h, 0.0)

    # ---- output head: narrow [tm, num_critics] store ----
    q = jnp.dot(h.astype(jnp.bfloat16), w3_ref[...],
                preferred_element_type=jnp.float32) + b3_ref[...]
    out_ref[...] = q.astype(out_ref.dtype)


def _choose_tile(batch):
    """Pick the batch tile: >=2 tiles whenever the batch allows (v7x megacore sharding
    + DMA pipelining), tm derived from the tile count so ragged padding stays small,
    tm capped at TM_MAX and rounded up to the 8-row sublane granule."""
    min_tiles = 2 if batch >= 2 * MIN_TM else 1
    n_tiles = max(min_tiles, _cdiv(batch, TM_MAX))
    return _round_up(_cdiv(batch, n_tiles), MIN_TM)


def droq_critic_forward(obs, action, params):
    """obs: [B, obs_dim], action: [B, act_dim] -> q: [B, num_critics]."""
    B, obs_dim = obs.shape
    act_dim = action.shape[1]
    H = params["w2"].shape[0]
    num_critics = params["num_critics"]

    tm = _choose_tile(B)
    grid = (_cdiv(B, tm),)  # ragged final tile handled by Pallas (masked write-back)

    args = (
        obs, action,
        params["w1o"], params["w1a"], params["b1"], params["g1"], params["be1"],
        params["w2"], params["b2"], params["g2"], params["be2"],
        params["w3"], params["b3"],
    )

    def row_spec(d):
        return pl.BlockSpec((tm, d), lambda i: (i, 0))

    def const_spec(shape):
        # Constant index_map -> block never changes -> weights stay resident in VMEM.
        return pl.BlockSpec(shape, lambda i: (0, 0))

    in_specs = [row_spec(obs_dim), row_spec(act_dim)]
    in_specs += [const_spec(tuple(a.shape)) for a in args[2:]]

    D = obs_dim + act_dim
    flops = 2 * B * (D * H + H * H + H * num_critics)
    bytes_accessed = (sum(int(a.size) * a.dtype.itemsize for a in args)
                      + B * num_critics * 4)
    cost = pl.CostEstimate(flops=flops, transcendentals=2 * B,
                           bytes_accessed=bytes_accessed)

    return pl.pallas_call(
        droq_critic_kernel,
        out_shape=jax.ShapeDtypeStruct((B, num_critics), jnp.float32),
        grid=grid,
        in_specs=in_specs,
        out_specs=pl.BlockSpec((tm, num_critics), lambda i: (i, 0)),
        compiler_params=pltpu.CompilerParams(dimension_semantics=("parallel",)),
        cost_estimate=cost,
    )(*args)


def init_params(key, obs_dim, act_dim, hidden_size=128, num_critics=1):
    """Init mimicking torch.nn.Linear (uniform +-1/sqrt(fan_in)) and torch.nn.LayerNorm
    (gamma=1, beta=0).  Weights stored [in, out]; W1 pre-split into obs/action halves;
    the head is kept narrow ([H, num_critics]).  Matmul weights kept in bf16 (the
    kernel accumulates in f32)."""
    ks = jax.random.split(key, 6)

    def linear(kw, kb, fan_in, fan_out):
        bound = 1.0 / jnp.sqrt(float(fan_in))
        w = jax.random.uniform(kw, (fan_in, fan_out), jnp.float32, -bound, bound)
        b = jax.random.uniform(kb, (1, fan_out), jnp.float32, -bound, bound)
        return w, b

    D = obs_dim + act_dim
    w1, b1 = linear(ks[0], ks[1], D, hidden_size)
    w2, b2 = linear(ks[2], ks[3], hidden_size, hidden_size)
    w3, b3 = linear(ks[4], ks[5], hidden_size, num_critics)

    ones_h = jnp.ones((1, hidden_size), jnp.float32)
    zeros_h = jnp.zeros((1, hidden_size), jnp.float32)

    return {
        "w1o": w1[:obs_dim].astype(jnp.bfloat16),
        "w1a": w1[obs_dim:].astype(jnp.bfloat16),
        "b1": b1, "g1": ones_h, "be1": zeros_h,
        "w2": w2.astype(jnp.bfloat16),
        "b2": b2, "g2": ones_h, "be2": zeros_h,
        "w3": w3.astype(jnp.bfloat16),
        "b3": b3,
        "num_critics": num_critics,
        # full-precision copies kept only for the reference checks below
        "w1_f32": w1, "w2_f32": w2, "w3_f32": w3,
    }


def reference_forward_bf16(obs, action, params):
    """Pure-JAX reference doing the exact bf16-weight / f32-accumulate arithmetic the
    kernel performs."""
    o = obs.astype(jnp.bfloat16)
    a = action.astype(jnp.bfloat16)
    h = (jnp.dot(o, params["w1o"], preferred_element_type=jnp.float32)
         + jnp.dot(a, params["w1a"], preferred_element_type=jnp.float32)
         + params["b1"])
    h = _layernorm_f32(h, params["g1"], params["be1"])
    h = jnp.maximum(h, 0.0)
    h = jnp.dot(h.astype(jnp.bfloat16), params["w2"],
                preferred_element_type=jnp.float32) + params["b2"]
    h = _layernorm_f32(h, params["g2"], params["be2"])
    h = jnp.maximum(h, 0.0)
    q = jnp.dot(h.astype(jnp.bfloat16), params["w3"],
                preferred_element_type=jnp.float32) + params["b3"]
    return q


def reference_forward_f32(obs, action, params):
    """Full-f32 reference matching the PyTorch module semantics."""
    x = jnp.concatenate([obs, action], axis=-1).astype(jnp.float32)
    h = x @ params["w1_f32"] + params["b1"]
    h = _layernorm_f32(h, params["g1"], params["be1"])
    h = jnp.maximum(h, 0.0)
    h = h @ params["w2_f32"] + params["b2"]
    h = _layernorm_f32(h, params["g2"], params["be2"])
    h = jnp.maximum(h, 0.0)
    return h @ params["w3_f32"] + params["b3"]


if __name__ == "__main__":
    B = 8
    obs_dim, act_dim = 24, 8          # concatenated input dim = 32
    hidden_size = 128
    num_critics = 1

    key = jax.random.PRNGKey(0)
    k_obs, k_act, k_par = jax.random.split(key, 3)
    obs = jax.random.normal(k_obs, (B, obs_dim), jnp.float32)
    action = jax.random.normal(k_act, (B, act_dim), jnp.float32)
    params = init_params(k_par, obs_dim, act_dim, hidden_size, num_critics)

    q = droq_critic_forward(obs, action, params)
    jax.block_until_ready(q)
    assert q.shape == (B, num_critics)

    # Strict check against the arithmetically-identical bf16 reference.
    q_bf = reference_forward_bf16(obs, action, params)
    assert jnp.allclose(q, q_bf, atol=2e-3, rtol=2e-3), "kernel != bf16 reference"

    # Loose check against the full-f32 PyTorch-semantics reference
    # (tolerance accounts for bf16 weight storage).
    q_f32 = reference_forward_f32(obs, action, params)
    assert jnp.allclose(q, q_f32, atol=5e-2, rtol=5e-2), "kernel drifted from f32 reference"

    print("KERNEL_OK")
</pallas_src>

<mosaic_0001>
module attributes {stable_mosaic.version = 11 : i64} {
  func.func @droq_critic_kernel(%arg0: i32, %arg1: memref<8x24xf32, #tpu.memory_space<vmem>>, %arg2: memref<8x8xf32, #tpu.memory_space<vmem>>, %arg3: memref<24x128xbf16, #tpu.memory_space<vmem>>, %arg4: memref<8x128xbf16, #tpu.memory_space<vmem>>, %arg5: memref<1x128xf32, #tpu.memory_space<vmem>>, %arg6: memref<1x128xf32, #tpu.memory_space<vmem>>, %arg7: memref<1x128xf32, #tpu.memory_space<vmem>>, %arg8: memref<128x128xbf16, #tpu.memory_space<vmem>>, %arg9: memref<1x128xf32, #tpu.memory_space<vmem>>, %arg10: memref<1x128xf32, #tpu.memory_space<vmem>>, %arg11: memref<1x128xf32, #tpu.memory_space<vmem>>, %arg12: memref<128x1xbf16, #tpu.memory_space<vmem>>, %arg13: memref<1x1xf32, #tpu.memory_space<vmem>>, %arg14: memref<8x1xf32, #tpu.memory_space<vmem>>) attributes {dimension_semantics = [#tpu.dimension_semantics<parallel>], iteration_bounds = array<i64: 1>, scalar_prefetch = 0 : i64, scratch_operands = 0 : i64, tpu.core_type = #tpu.core_type<tc>, window_params = [{transform_indices = @transform_0, window_bounds = array<i64: 8, 24>}, {transform_indices = @transform_1, window_bounds = array<i64: 8, 8>}, {pipeline_mode = #tpu.pipeline_mode<synchronous>, transform_indices = @transform_2, window_bounds = array<i64: 24, 128>}, {pipeline_mode = #tpu.pipeline_mode<synchronous>, transform_indices = @transform_3, window_bounds = array<i64: 8, 128>}, {pipeline_mode = #tpu.pipeline_mode<synchronous>, transform_indices = @transform_4, window_bounds = array<i64: 1, 128>}, {pipeline_mode = #tpu.pipeline_mode<synchronous>, transform_indices = @transform_5, window_bounds = array<i64: 1, 128>}, {pipeline_mode = #tpu.pipeline_mode<synchronous>, transform_indices = @transform_6, window_bounds = array<i64: 1, 128>}, {pipeline_mode = #tpu.pipeline_mode<synchronous>, transform_indices = @transform_7, window_bounds = array<i64: 128, 128>}, {pipeline_mode = #tpu.pipeline_mode<synchronous>, transform_indices = @transform_8, window_bounds = array<i64: 1, 128>}, {pipeline_mode = #tpu.pipeline_mode<synchronous>, transform_indices = @transform_9, window_bounds = array<i64: 1, 128>}, {pipeline_mode = #tpu.pipeline_mode<synchronous>, transform_indices = @transform_10, window_bounds = array<i64: 1, 128>}, {pipeline_mode = #tpu.pipeline_mode<synchronous>, transform_indices = @transform_11, window_bounds = array<i64: 128, 1>}, {pipeline_mode = #tpu.pipeline_mode<synchronous>, transform_indices = @transform_12, window_bounds = array<i64: 1, 1>}, {transform_indices = @transform_13, window_bounds = array<i64: 8, 1>}]} {
    %c0 = arith.constant 0 : index
    %c0_0 = arith.constant 0 : index
    %0 = vector.load %arg1[%c0, %c0_0] : memref<8x24xf32, #tpu.memory_space<vmem>>, vector<8x24xf32>
    %1 = arith.truncf %0 : vector<8x24xf32> to vector<8x24xbf16>
    %c0_1 = arith.constant 0 : index
    %c0_2 = arith.constant 0 : index
    %2 = vector.load %arg2[%c0_1, %c0_2] : memref<8x8xf32, #tpu.memory_space<vmem>>, vector<8x8xf32>
    %3 = arith.truncf %2 : vector<8x8xf32> to vector<8x8xbf16>
    %c0_3 = arith.constant 0 : index
    %c0_4 = arith.constant 0 : index
    %4 = vector.load %arg3[%c0_3, %c0_4] : memref<24x128xbf16, #tpu.memory_space<vmem>>, vector<24x128xbf16>
    %cst = arith.constant dense<0.000000e+00> : vector<8x128xf32>
    %5 = tpu.matmul %1, %4, %cst {dimension_numbers = #tpu.dot_dimension_numbers<[1], [0], [0], [1], [0, 0, 1, 1], [], []>} : vector<8x24xbf16>, vector<24x128xbf16>, vector<8x128xf32> -> vector<8x128xf32>
    %c0_5 = arith.constant 0 : index
    %c0_6 = arith.constant 0 : index
    %6 = vector.load %arg4[%c0_5, %c0_6] : memref<8x128xbf16, #tpu.memory_space<vmem>>, vector<8x128xbf16>
    %cst_7 = arith.constant dense<0.000000e+00> : vector<8x128xf32>
    %7 = tpu.matmul %3, %6, %cst_7 {dimension_numbers = #tpu.dot_dimension_numbers<[1], [0], [0], [1], [0, 0, 1, 1], [], []>} : vector<8x8xbf16>, vector<8x128xbf16>, vector<8x128xf32> -> vector<8x128xf32>
    %8 = arith.addf %5, %7 : vector<8x128xf32>
    %c0_8 = arith.constant 0 : index
    %c0_9 = arith.constant 0 : index
    %9 = vector.load %arg5[%c0_8, %c0_9] : memref<1x128xf32, #tpu.memory_space<vmem>>, vector<1x128xf32>
    %10 = vector.broadcast %9 : vector<1x128xf32> to vector<8x128xf32>
    %11 = arith.addf %8, %10 : vector<8x128xf32>
    %c0_10 = arith.constant 0 : index
    %c0_11 = arith.constant 0 : index
    %12 = vector.load %arg6[%c0_10, %c0_11] : memref<1x128xf32, #tpu.memory_space<vmem>>, vector<1x128xf32>
    %c0_12 = arith.constant 0 : index
    %c0_13 = arith.constant 0 : index
    %13 = vector.load %arg7[%c0_12, %c0_13] : memref<1x128xf32, #tpu.memory_space<vmem>>, vector<1x128xf32>
    %cst_14 = arith.constant dense<0.000000e+00> : vector<8xf32>
    %14 = vector.multi_reduction <add>, %11, %cst_14 [1] : vector<8x128xf32> to vector<8xf32>
    %15 = vector.shape_cast %14 : vector<8xf32> to vector<8x1xf32>
    %cst_15 = arith.constant 1.280000e+02 : f32
    %16 = vector.broadcast %cst_15 : f32 to vector<8x1xf32>
    %17 = arith.divf %15, %16 : vector<8x1xf32>
    %18 = arith.mulf %11, %11 : vector<8x128xf32>
    %cst_16 = arith.constant dense<0.000000e+00> : vector<8xf32>
    %19 = vector.multi_reduction <add>, %18, %cst_16 [1] : vector<8x128xf32> to vector<8xf32>
    %20 = vector.shape_cast %19 : vector<8xf32> to vector<8x1xf32>
    %cst_17 = arith.constant 1.280000e+02 : f32
    %21 = vector.broadcast %cst_17 : f32 to vector<8x1xf32>
    %22 = arith.divf %20, %21 : vector<8x1xf32>
    %23 = arith.mulf %17, %17 : vector<8x1xf32>
    %24 = arith.subf %22, %23 : vector<8x1xf32>
    %cst_18 = arith.constant 0.000000e+00 : f32
    %25 = vector.broadcast %cst_18 : f32 to vector<8x1xf32>
    %26 = arith.maximumf %24, %25 : vector<8x1xf32>
    %27 = vector.broadcast %17 : vector<8x1xf32> to vector<8x128xf32>
    %28 = arith.subf %11, %27 : vector<8x128xf32>
    %cst_19 = arith.constant 9.99999974E-6 : f32
    %29 = vector.broadcast %cst_19 : f32 to vector<8x1xf32>
    %30 = arith.addf %26, %29 : vector<8x1xf32>
    %31 = math.rsqrt %30 : vector<8x1xf32>
    %32 = vector.broadcast %31 : vector<8x1xf32> to vector<8x128xf32>
    %33 = arith.mulf %28, %32 : vector<8x128xf32>
    %34 = vector.broadcast %12 : vector<1x128xf32> to vector<8x128xf32>
    %35 = arith.mulf %33, %34 : vector<8x128xf32>
    %36 = vector.broadcast %13 : vector<1x128xf32> to vector<8x128xf32>
    %37 = arith.addf %35, %36 : vector<8x128xf32>
    %cst_20 = arith.constant 0.000000e+00 : f32
    %38 = vector.broadcast %cst_20 : f32 to vector<8x128xf32>
    %39 = arith.maximumf %37, %38 : vector<8x128xf32>
    %40 = arith.truncf %39 : vector<8x128xf32> to vector<8x128xbf16>
    %c0_21 = arith.constant 0 : index
    %c0_22 = arith.constant 0 : index
    %41 = vector.load %arg8[%c0_21, %c0_22] : memref<128x128xbf16, #tpu.memory_space<vmem>>, vector<128x128xbf16>
    %cst_23 = arith.constant dense<0.000000e+00> : vector<8x128xf32>
    %42 = tpu.matmul %40, %41, %cst_23 {dimension_numbers = #tpu.dot_dimension_numbers<[1], [0], [0], [1], [0, 0, 1, 1], [], []>} : vector<8x128xbf16>, vector<128x128xbf16>, vector<8x128xf32> -> vector<8x128xf32>
    %c0_24 = arith.constant 0 : index
    %c0_25 = arith.constant 0 : index
    %43 = vector.load %arg9[%c0_24, %c0_25] : memref<1x128xf32, #tpu.memory_space<vmem>>, vector<1x128xf32>
    %44 = vector.broadcast %43 : vector<1x128xf32> to vector<8x128xf32>
    %45 = arith.addf %42, %44 : vector<8x128xf32>
    %c0_26 = arith.constant 0 : index
    %c0_27 = arith.constant 0 : index
    %46 = vector.load %arg10[%c0_26, %c0_27] : memref<1x128xf32, #tpu.memory_space<vmem>>, vector<1x128xf32>
    %c0_28 = arith.constant 0 : index
    %c0_29 = arith.constant 0 : index
    %47 = vector.load %arg11[%c0_28, %c0_29] : memref<1x128xf32, #tpu.memory_space<vmem>>, vector<1x128xf32>
    %cst_30 = arith.constant dense<0.000000e+00> : vector<8xf32>
    %48 = vector.multi_reduction <add>, %45, %cst_30 [1] : vector<8x128xf32> to vector<8xf32>
    %49 = vector.shape_cast %48 : vector<8xf32> to vector<8x1xf32>
    %cst_31 = arith.constant 1.280000e+02 : f32
    %50 = vector.broadcast %cst_31 : f32 to vector<8x1xf32>
    %51 = arith.divf %49, %50 : vector<8x1xf32>
    %52 = arith.mulf %45, %45 : vector<8x128xf32>
    %cst_32 = arith.constant dense<0.000000e+00> : vector<8xf32>
    %53 = vector.multi_reduction <add>, %52, %cst_32 [1] : vector<8x128xf32> to vector<8xf32>
    %54 = vector.shape_cast %53 : vector<8xf32> to vector<8x1xf32>
    %cst_33 = arith.constant 1.280000e+02 : f32
    %55 = vector.broadcast %cst_33 : f32 to vector<8x1xf32>
    %56 = arith.divf %54, %55 : vector<8x1xf32>
    %57 = arith.mulf %51, %51 : vector<8x1xf32>
    %58 = arith.subf %56, %57 : vector<8x1xf32>
    %cst_34 = arith.constant 0.000000e+00 : f32
    %59 = vector.broadcast %cst_34 : f32 to vector<8x1xf32>
    %60 = arith.maximumf %58, %59 : vector<8x1xf32>
    %61 = vector.broadcast %51 : vector<8x1xf32> to vector<8x128xf32>
    %62 = arith.subf %45, %61 : vector<8x128xf32>
    %cst_35 = arith.constant 9.99999974E-6 : f32
    %63 = vector.broadcast %cst_35 : f32 to vector<8x1xf32>
    %64 = arith.addf %60, %63 : vector<8x1xf32>
    %65 = math.rsqrt %64 : vector<8x1xf32>
    %66 = vector.broadcast %65 : vector<8x1xf32> to vector<8x128xf32>
    %67 = arith.mulf %62, %66 : vector<8x128xf32>
    %68 = vector.broadcast %46 : vector<1x128xf32> to vector<8x128xf32>
    %69 = arith.mulf %67, %68 : vector<8x128xf32>
    %70 = vector.broadcast %47 : vector<1x128xf32> to vector<8x128xf32>
    %71 = arith.addf %69, %70 : vector<8x128xf32>
    %cst_36 = arith.constant 0.000000e+00 : f32
    %72 = vector.broadcast %cst_36 : f32 to vector<8x128xf32>
    %73 = arith.maximumf %71, %72 : vector<8x128xf32>
    %74 = arith.truncf %73 : vector<8x128xf32> to vector<8x128xbf16>
    %c0_37 = arith.constant 0 : index
    %c0_38 = arith.constant 0 : index
    %75 = vector.load %arg12[%c0_37, %c0_38] : memref<128x1xbf16, #tpu.memory_space<vmem>>, vector<128x1xbf16>
    %cst_39 = arith.constant dense<0.000000e+00> : vector<8x1xf32>
    %76 = tpu.matmul %74, %75, %cst_39 {dimension_numbers = #tpu.dot_dimension_numbers<[1], [0], [0], [1], [0, 0, 1, 1], [], []>} : vector<8x128xbf16>, vector<128x1xbf16>, vector<8x1xf32> -> vector<8x1xf32>
    %c0_40 = arith.constant 0 : index
    %c0_41 = arith.constant 0 : index
    %77 = vector.load %arg13[%c0_40, %c0_41] : memref<1x1xf32, #tpu.memory_space<vmem>>, vector<1x1xf32>
    %78 = vector.broadcast %77 : vector<1x1xf32> to vector<8x1xf32>
    %79 = arith.addf %76, %78 : vector<8x1xf32>
    %c0_42 = arith.constant 0 : index
    %c0_43 = arith.constant 0 : index
    %80 = vector.load %arg14[%c0_42, %c0_43] : memref<8x1xf32, #tpu.memory_space<vmem>>, vector<8x1xf32>
    tpu.vector_store %arg14[%c0_42, %c0_43], %79 {strides = array<i32>} : memref<8x1xf32, #tpu.memory_space<vmem>>, vector<8x1xf32>,
    return
  }
  func.func @transform_0(%arg0: i32) -> (i32, i32) {
    %c0_i32 = arith.constant 0 : i32
    %c0_i32_0 = arith.constant 0 : i32
    return %arg0, %c0_i32 : i32, i32
  }
  func.func @transform_1(%arg0: i32) -> (i32, i32) {
    %c0_i32 = arith.constant 0 : i32
    %c0_i32_0 = arith.constant 0 : i32
    return %arg0, %c0_i32 : i32, i32
  }
  func.func @transform_2(%arg0: i32) -> (i32, i32) {
    %c0_i32 = arith.constant 0 : i32
    %c0_i32_0 = arith.constant 0 : i32
    %c0_i32_1 = arith.constant 0 : i32
    return %c0_i32, %c0_i32_0 : i32, i32
  }
  func.func @transform_3(%arg0: i32) -> (i32, i32) {
    %c0_i32 = arith.constant 0 : i32
    %c0_i32_0 = arith.constant 0 : i32
    %c0_i32_1 = arith.constant 0 : i32
    return %c0_i32, %c0_i32_0 : i32, i32
  }
  func.func @transform_4(%arg0: i32) -> (i32, i32) {
    %c0_i32 = arith.constant 0 : i32
    %c0_i32_0 = arith.constant 0 : i32
    %c0_i32_1 = arith.constant 0 : i32
    return %c0_i32, %c0_i32_0 : i32, i32
  }
  func.func @transform_5(%arg0: i32) -> (i32, i32) {
    %c0_i32 = arith.constant 0 : i32
    %c0_i32_0 = arith.constant 0 : i32
    %c0_i32_1 = arith.constant 0 : i32
    return %c0_i32, %c0_i32_0 : i32, i32
  }
  func.func @transform_6(%arg0: i32) -> (i32, i32) {
    %c0_i32 = arith.constant 0 : i32
    %c0_i32_0 = arith.constant 0 : i32
    %c0_i32_1 = arith.constant 0 : i32
    return %c0_i32, %c0_i32_0 : i32, i32
  }
  func.func @transform_7(%arg0: i32) -> (i32, i32) {
    %c0_i32 = arith.constant 0 : i32
    %c0_i32_0 = arith.constant 0 : i32
    %c0_i32_1 = arith.constant 0 : i32
    return %c0_i32, %c0_i32_0 : i32, i32
  }
  func.func @transform_8(%arg0: i32) -> (i32, i32) {
    %c0_i32 = arith.constant 0 : i32
    %c0_i32_0 = arith.constant 0 : i32
    %c0_i32_1 = arith.constant 0 : i32
    return %c0_i32, %c0_i32_0 : i32, i32
  }
  func.func @transform_9(%arg0: i32) -> (i32, i32) {
    %c0_i32 = arith.constant 0 : i32
    %c0_i32_0 = arith.constant 0 : i32
    %c0_i32_1 = arith.constant 0 : i32
    return %c0_i32, %c0_i32_0 : i32, i32
  }
  func.func @transform_10(%arg0: i32) -> (i32, i32) {
    %c0_i32 = arith.constant 0 : i32
    %c0_i32_0 = arith.constant 0 : i32
    %c0_i32_1 = arith.constant 0 : i32
    return %c0_i32, %c0_i32_0 : i32, i32
  }
  func.func @transform_11(%arg0: i32) -> (i32, i32) {
    %c0_i32 = arith.constant 0 : i32
    %c0_i32_0 = arith.constant 0 : i32
    %c0_i32_1 = arith.constant 0 : i32
    return %c0_i32, %c0_i32_0 : i32, i32
  }
  func.func @transform_12(%arg0: i32) -> (i32, i32) {
    %c0_i32 = arith.constant 0 : i32
    %c0_i32_0 = arith.constant 0 : i32
    %c0_i32_1 = arith.constant 0 : i32
    return %c0_i32, %c0_i32_0 : i32, i32
  }
  func.func @transform_13(%arg0: i32) -> (i32, i32) {
    %c0_i32 = arith.constant 0 : i32
    %c0_i32_0 = arith.constant 0 : i32
    return %arg0, %c0_i32 : i32, i32
  }
}

</mosaic_0001>

<bundles_post_ra>
// kernel: tpu_custom_call.1
= control target key start
LH: loop header
LB: loop body
LE: loop exit
PB: predicated region body
PF: predicated region fallthrough
CT: control target
= control target key end

     0   :  { %s867_s0 = inlined_call_operand.vmem [shape: f32[8,24], index: 0, kind: input, shape index: {}]   ;;  %s868_s1 = inlined_call_operand.hbm [shape: f32[8,8], index: 1, kind: input, shape index: {}]   ;;  %s869_s2 = inlined_call_operand.hbm [shape: bf16[24,128], index: 2, kind: input, shape index: {}]   ;;  %s870_s3 = inlined_call_operand.hbm [shape: bf16[8,128], index: 3, kind: input, shape index: {}]   ;;  %s871_s4 = inlined_call_operand.vmem [shape: f32[1,128], index: 4, kind: input, shape index: {}]   ;;  %s872_s5 = inlined_call_operand.hbm [shape: f32[1,128], index: 5, kind: input, shape index: {}]   ;;  %s873_s6 = inlined_call_operand.hbm [shape: f32[1,128], index: 6, kind: input, shape index: {}]   ;;  %s874_s7 = inlined_call_operand.vmem [shape: bf16[128,128], index: 7, kind: input, shape index: {}]   ;;  %s875_s8 = inlined_call_operand.hbm [shape: f32[1,128], index: 8, kind: input, shape index: {}]   ;;  %s876_s9 = inlined_call_operand.vmem [shape: f32[1,128], index: 9, kind: input, shape index: {}]   ;;  %s877_s10 = inlined_call_operand.vmem [shape: f32[1,128], index: 10, kind: input, shape index: {}]   ;;  %s878_s11 = inlined_call_operand.vmem [shape: bf16[128,1], index: 11, kind: input, shape index: {}]   ;;  %s879_s12 = inlined_call_operand.<no memory space> [shape: f32[1,1], index: 12, kind: input, shape index: {}]   ;;  %s880_s13 = inlined_call_operand.vmem [shape: f32[8,1], index: 13, kind: output, shape index: {}]  }
   0x1   :  { %v18_v0 = vstv %s879_s12 }
   0x2   :  { %19 = vst [vmem:[#allocation2] sm:$0x1] %v18_v0 }
   0x3   :  { %20 = vsyncpa [#allocation4], 0 }
   0x4   :  { %21 = vsyncpa [#allocation6], 0 }
   0x5   :  { %22 = vsyncpa [#allocation9], 0  ;;  %s41_s29 = sshll.u32 %s869_s2, 4  ;;  %s42_s29 = int_to_ptr.hbm [resolvable:$true] %s41_s29 }
   0x6   :  { %23 = vsyncpa [#allocation12], 0  ;;  %s704_s30 = smov [#allocation5]   ;;  %s68_s17 = sshll.u32 %s872_s5, 4  ;;  %s69_s17 = int_to_ptr.hbm [resolvable:$true] %s68_s17 }
   0x7   :  { %s43_s14 = sshll.u32 %s704_s30, 4  ;;  %s705_s18 = smov 64   ;;  %s44_s14 = int_to_ptr.vmem [resolvable:$true] %s43_s14 }
   0x8   :  { %s706_s19 = smov 4   ;;  %s707_s12 = smov [#allocation8]  }
   0x9   :  { %49 = dma.hbm_to_vmem [thread:$0]  %s42_s29, 192, %s44_s14, [#allocation6], %s705_s18, %s705_s18, %s706_s19  }
   0xa   :  { %s70_s20 = sshll.u32 %s707_s12, 4  ;;  %s31_s23 = sshll.u32 %s868_s1, 4  ;;  %s71_s20 = int_to_ptr.vmem [resolvable:$true] %s70_s20  ;;  %s32_s23 = int_to_ptr.hbm [resolvable:$true] %s31_s23 }
   0xb   :  { %73 = dma.hbm_to_vmem [thread:$0]  %s69_s17, 16, %s71_s20, [#allocation9]  }
   0xc   :  { %s55_s25 = sshll.u32 %s870_s3, 4  ;;  %s708_s26 = smov [#allocation3]   ;;  %s56_s25 = int_to_ptr.hbm [resolvable:$true] %s55_s25 }
   0xd   :  { %s33_s27 = sshll.u32 %s708_s26, 4  ;;  %s709_s5 = smov [#allocation7]   ;;  %s34_s27 = int_to_ptr.vmem [resolvable:$true] %s33_s27 }
   0xe   :  { %36 = dma.hbm_to_vmem [thread:$0]  %s32_s23, 128, %s34_s27, [#allocation4]  }
   0xf   :  { %s57_s28 = sshll.u32 %s709_s5, 4  ;;  %s79_s14 = sshll.u32 %s873_s6, 4  ;;  %s58_s28 = int_to_ptr.vmem [resolvable:$true] %s57_s28  ;;  %s80_s14 = int_to_ptr.hbm [resolvable:$true] %s79_s14 }
  0x10   :  { %60 = dma.hbm_to_vmem [thread:$0]  %s56_s25, 64, %s58_s28, [#allocation6]  }
  0x11   :  { %s92_s16 = sshll.u32 %s875_s8, 4  ;;  %s710_s17 = smov [#allocation10]   ;;  %s93_s16 = int_to_ptr.hbm [resolvable:$true] %s92_s16 }
  0x12   :  { %s81_s3 = sshll.u32 %s710_s17, 4  ;;  %s711_s18 = smov [#allocation11]   ;;  %s82_s3 = int_to_ptr.vmem [resolvable:$true] %s81_s3 }
  0x13   :  { %84 = dma.hbm_to_vmem [thread:$0]  %s80_s14, 16, %s82_s3, [#allocation9]  }
  0x14   :  { %s94_s19 = sshll.u32 %s711_s18, 4  ;;  %s95_s19 = int_to_ptr.vmem [resolvable:$true] %s94_s19 }
  0x15   :  { %97 = dma.hbm_to_vmem [thread:$0]  %s93_s16, 16, %s95_s19, [#allocation12]  }
  0x16   :  { %696 = dma.done.wait [#allocation4], 128  }
  0x17   :  { %697 = vsyncadd [#allocation4], 4294967168 }
  0x18   :  { %698 = dma.done.wait [#allocation6], 256  }
  0x19   :  { %699 = vsyncadd [#allocation6], 4294967040 }
  0x1a   :  { %700 = dma.done.wait [#allocation9], 32  }
  0x1b   :  { %701 = vsyncadd [#allocation9], 4294967264 }
  0x1c   :  { %702 = dma.done.wait [#allocation12], 16  }
  0x1d   :  { %703 = vsyncadd [#allocation12], 4294967280  ;;  %vm143_vm0 = vcmask 1043456   ;;  %v138_v1 = vld [vmem:[#allocation7] sm:$0xf]  ;;  %v133_v2 = vld [vmem:[#allocation3] sm:$0xff] }
  0x1e   :  { %v137_v3 = vld [vmem:[#allocation5 + $0x8] sm:$0xf]  ;;  %v145_v4 = vsel %vm143_vm0, %v138_v1, 0  ;;  %v134_v5 = vpack.c.bf16 %v133_v2, %v133_v2  ;;  %vm139_vm1 = vcmask 64512   ;;  %v513_v9 = vld [vmem:[#allocation5] sm:$0xff]  ;;  %v131_v10 = vld [vmem:[%s867_s0] sm:$0xff] }
  0x1f   :  { %v165_v6 = vunpack.c.l.b16 %v137_v3  ;;  %154 = vmatpush.bf16.msra.mxu0 %v145_v4  ;;  %v132_v11 = vpack.c.bf16 %v131_v10, %v131_v10  ;;  %vm169_vm2 = vcmask 195584   ;;  %v539_v13 = vld [vmem:[%s871_s4] ss:$0 sm:$0xff]  ;;  %v712_v20 = vmov 128.0   ;;  %v521_v21 = vld [vmem:[%s874_s7 + $0x38] sm:$0xff]  ;;  %v520_v23 = vld [vmem:[%s874_s7 + $0x30] sm:$0xff] }
  0x20   :  { %546 = vrcp.f32 %v712_v20  ;;  %304 = vmatpush.bf16.msra.mxu2 %v521_v21  ;;  %v519_v25 = vld [vmem:[%s874_s7 + $0x28] sm:$0xff]  ;;  %v518_v27 = vld [vmem:[%s874_s7 + $0x20] sm:$0xff]  ;;  %v517_v29 = vld [vmem:[%s874_s7 + $0x18] sm:$0xff]  ;;  %vm433_vm10 = vcmask 7168  }
  0x21   :  { %v167_v7 = vpack.c.b16 %v165_v6, %v165_v6  ;;  %v516_v31 = vld [vmem:[%s874_s7 + $0x10] sm:$0xff]  ;;  %v515_v34 = vld [vmem:[%s874_s7 + $0x8] sm:$0xff]  ;;  %v514_v36 = vld [vmem:[%s874_s7] sm:$0xff] }
  0x22   :  { %443 = vmatmul.msk.bf16.vlgmr.msra.gmra.mxu0 %vm139_vm1, %v134_v5  ;;  %v540_v50 = vld [vmem:[#allocation8] ss:$0 sm:$0xff]  ;;  %v541_v53 = vld [vmem:[#allocation10] ss:$0 sm:$0xff]  ;;  %v542_v58 = vld [vmem:[#allocation11] ss:$0 sm:$0xff] }
  0x23   :  { %v174_v8 = vsel %vm143_vm0, %v167_v7, 0  ;;  %v529_v63 = vld [vmem:[%s878_s11 + $0x38] sm:$0xff]  ;;  %v528_v0 = vld [vmem:[%s878_s11 + $0x30] sm:$0xff]  ;;  %v527_v1 = vld [vmem:[%s878_s11 + $0x28] sm:$0xff] }
  0x24   :  { %182 = vmatpush.bf16.msra.mxu1 %v174_v8  ;;  %305 = vmatpush.bf16.msra.mxu2 %v520_v23  ;;  %v526_v2 = vld [vmem:[%s878_s11 + $0x20] sm:$0xff]  ;;  %v525_v3 = vld [vmem:[%s878_s11 + $0x18] sm:$0xff]  ;;  %v524_v4 = vld [vmem:[%s878_s11 + $0x10] sm:$0xff] }
  0x25   :  { %420 = vmatpush.bf16.msra.mxu3 %v529_v63  ;;  %v523_v6 = vld [vmem:[%s878_s11 + $0x8] sm:$0xff]  ;;  %v522_v8 = vld [vmem:[%s878_s11] sm:$0xff] }
  0x26   :  { %v547_v22 = vpop.eup %546 }
  0x27   :  { %v199_v24 = vmul.f32 128.0, %v547_v22  ;;  %vm203_vm3 = vweird.f32 %v547_v22 }
  0x28   :  { %183 = vmatpush.bf16.msra.mxu1 %v513_v9  ;;  %306 = vmatpush.bf16.msra.mxu2 %v519_v25  ;;  %v544_v25 = vld [vmem:[%s877_s10] ss:$0 sm:$0xff] }
  0x29   :  { %v200_v26 = vsub.f32 1.0, %v199_v24  ;;  %421 = vmatpush.bf16.msra.mxu3 %v528_v0 }
  0x2b   :  { %448 = vmatmul.msk.bf16.vlgmr.msra.gmra.mxu1 %vm169_vm2, %v132_v11  ;;  %v201_v28 = vmul.f32 %v547_v22, %v200_v26 }
  0x2c   :  { %307 = vmatpush.bf16.msra.mxu2 %v518_v27 }
  0x2d   :  { %v202_v30 = vadd.f32 %v547_v22, %v201_v28  ;;  %422 = vmatpush.bf16.msra.mxu3 %v527_v1 }
  0x2f   :  { %v204_v33 = vsel %vm203_vm3, %v547_v22, %v202_v30  ;;  %v543_v22 = vld [vmem:[%s876_s9] ss:$0 sm:$0xff] }
  0x30   :  { %308 = vmatpush.bf16.msra.mxu2 %v517_v29  ;;  %v545_v30 = vld [vmem:[#allocation2] ss:$0 sm:$0xff] }
  0x31   :  { %423 = vmatpush.bf16.msra.mxu3 %v526_v2 }
  0x34   :  { %309 = vmatpush.bf16.msra.mxu2 %v516_v31 }
  0x35   :  { %424 = vmatpush.bf16.msra.mxu3 %v525_v3 }
  0x38   :  { %310 = vmatpush.bf16.msra.mxu2 %v515_v34 }
  0x39   :  { %425 = vmatpush.bf16.msra.mxu3 %v524_v4 }
  0x3c   :  { %311 = vmatpush.bf16.msra.mxu2 %v514_v36 }
  0x3d   :  { %426 = vmatpush.bf16.msra.mxu3 %v523_v6 }
  0x41   :  { %427 = vmatpush.bf16.msra.mxu3 %v522_v8 }
  0x9f   :  { %v156_v12 = vpop.f32.mrf.mxu0 }
  0xa7   :  { %v158_v14 = vpop.f32.mrf.mxu0 }
  0xa8   :  { %v185_v15 = vpop.f32.mrf.mxu1 }
  0xa9   :  { %v186_v16 = vadd.f32 %v185_v15, %v156_v12 }
  0xab   :  { %v193_v17 = vadd.f32 %v539_v13, %v186_v16 }
  0xad   :  { %196 = vadd.xlane.f32.xlu0 %v193_v17  ;;  %v206_v19 = vmul.f32 %v193_v17, %v193_v17 }
  0xb0   :  { %v187_v18 = vpop.f32.mrf.mxu1 }
  0xb5   :  { %207 = vadd.xlane.f32.xlu0 %v206_v19 }
 0x120   :  { %v197_v32 = vpop.xlane.xlu0 %196 }
 0x121   :  { %v205_v35 = vmul.f32 %v204_v33, %v197_v32 }
 0x123   :  { %v210_v38 = vmul.f32 %v205_v35, %v205_v35  ;;  %v213_v49 = vsub.f32 %v193_v17, %v205_v35 }
 0x128   :  { %v208_v37 = vpop.xlane.xlu0 %207 }
 0x129   :  { %v209_v39 = vmul.f32 %v208_v37, %v204_v33 }
 0x12b   :  { %v211_v40 = vsub.f32 %v209_v39, %v210_v38 }
 0x12d   :  { %v212_v41 = vmax.f32 %v211_v40, 0.0 }
 0x12f   :  { %v214_v42 = vadd.f32 1e-05, %v212_v41 }
 0x131   :  { %548 = vrsqrt.f32 %v214_v42  ;;  %vm221_vm5 = vweird.f32 %v214_v42 }
 0x137   :  { %v549_v43 = vpop.eup %548 }
 0x138   :  { %v216_v44 = vmul.f32 %v549_v43, %v214_v42  ;;  %vm222_vm4 = vweird.f32 %v549_v43 }
 0x139   :  { %vm223_vm6 = vmor %vm221_vm5, %vm222_vm4 }
 0x13a   :  { %v217_v45 = vmul.f32 %v549_v43, %v216_v44 }
 0x13c   :  { %v218_v46 = vmul.f32 0.5, %v217_v45 }
 0x13e   :  { %v219_v47 = vsub.f32 1.5, %v218_v46 }
 0x140   :  { %v220_v48 = vmul.f32 %v549_v43, %v219_v47 }
 0x142   :  { %v224_v51 = vsel %vm223_vm6, %v549_v43, %v220_v48 }
 0x143   :  { %v225_v52 = vmul.f32 %v224_v51, %v213_v49 }
 0x145   :  { %v229_v54 = vmul.f32 %v540_v50, %v225_v52 }
 0x147   :  { %v233_v55 = vadd.f32 %v541_v53, %v229_v54 }
 0x149   :  { %v234_v56 = vmax.f32 %v233_v55, 0.0 }
 0x14b   :  { %v235_v57 = vpack.c.bf16 %v234_v56, %v234_v56 }
 0x14d   :  { %312 = vmatmul.bf16.vlgmr.msra.gmra.mxu2 %v235_v57 }
 0x1d0   :  { %v313_v59 = vpop.f32.mrf.mxu2 }
 0x1d1   :  { %v314_v60 = vadd.f32 %v542_v58, %v313_v59 }
 0x1d3   :  { %319 = vadd.xlane.f32.xlu1 %v314_v60  ;;  %v322_v62 = vmul.f32 %v314_v60, %v314_v60 }
 0x1d8   :  { %v315_v61 = vpop.f32.mrf.mxu2 }
 0x1db   :  { %323 = vadd.xlane.f32.xlu1 %v322_v62 }
 0x246   :  { %v320_v5 = vpop.xlane.xlu1 %319 }
 0x247   :  { %v321_v7 = vmul.f32 %v320_v5, %v204_v33 }
 0x249   :  { %v326_v10 = vmul.f32 %v321_v7, %v321_v7  ;;  %v329_v21 = vsub.f32 %v314_v60, %v321_v7 }
 0x24e   :  { %v324_v9 = vpop.xlane.xlu1 %323 }
 0x24f   :  { %v325_v11 = vmul.f32 %v324_v9, %v204_v33 }
 0x251   :  { %v327_v12 = vsub.f32 %v325_v11, %v326_v10 }
 0x253   :  { %v328_v13 = vmax.f32 %v327_v12, 0.0 }
 0x255   :  { %v330_v14 = vadd.f32 1e-05, %v328_v13 }
 0x257   :  { %550 = vrsqrt.f32 %v330_v14  ;;  %vm337_vm8 = vweird.f32 %v330_v14 }
 0x25d   :  { %v551_v15 = vpop.eup %550 }
 0x25e   :  { %v332_v16 = vmul.f32 %v551_v15, %v330_v14  ;;  %vm338_vm7 = vweird.f32 %v551_v15 }
 0x25f   :  { %vm339_vm9 = vmor %vm337_vm8, %vm338_vm7 }
 0x260   :  { %v333_v17 = vmul.f32 %v551_v15, %v332_v16 }
 0x262   :  { %v334_v18 = vmul.f32 0.5, %v333_v17 }
 0x264   :  { %v335_v19 = vsub.f32 1.5, %v334_v18 }
 0x266   :  { %v336_v20 = vmul.f32 %v551_v15, %v335_v19 }
 0x268   :  { %v340_v23 = vsel %vm339_vm9, %v551_v15, %v336_v20 }
 0x269   :  { %v341_v24 = vmul.f32 %v340_v23, %v329_v21 }
 0x26b   :  { %v345_v26 = vmul.f32 %v543_v22, %v341_v24 }
 0x26d   :  { %v349_v27 = vadd.f32 %v544_v25, %v345_v26 }
 0x26f   :  { %v350_v28 = vmax.f32 %v349_v27, 0.0 }
 0x271   :  { %v351_v29 = vpack.c.bf16 %v350_v28, %v350_v28 }
 0x273   :  { %428 = vmatmul.bf16.vlgmr.msra.gmra.mxu3 %v351_v29 }
 0x2f6   :  { %v429_v31 = vpop.f32.mrf.mxu3 }
 0x2f7   :  { %v430_v32 = vadd.f32 %v545_v30, %v429_v31 }
 0x2f9   :  { %434 = vst.msk [vmem:[%s880_s13] sm:$0xff] %vm433_vm10, %v430_v32 }
 0x2fe   :  { %v431_v33 = vpop.f32.mrf.mxu3 }
 0x2ff   :  { %439 = vsyncpa [#allocation4], 1 }
 0x300   :  { %440 = vsyncpa [#allocation6], 1 }
 0x301   :  { %441 = vsyncpa [#allocation9], 1 }
 0x302   :  { %442 = vsyncpa [#allocation12], 1 }

</bundles_post_ra>
